<compile_context>
chip_gen: v7x
topology: tpu7x:2x2x1
jax: 0.10.0
libtpu: 0.0.40
codegen_flags: <defaults>
</compile_context>

<pallas_src>
import math

import jax
import jax.numpy as jnp
from jax.experimental import pallas as pl
from jax.experimental.pallas import tpu as pltpu


def _round_up(x, m):
    return (x + m - 1) // m * m


# ---------------------------------------------------------------------------
# Fused kernel: both (pre-transposed) weights resident in VMEM, 1-D grid over
# row tiles.  o = (x @ W1t + b1) @ W2t + b2 with f32 MXU accumulation.
# ---------------------------------------------------------------------------
def _mlp_fused_kernel(x_ref, w1t_ref, b1_ref, w2t_ref, b2_ref, o_ref):
    x = x_ref[...]
    h = jnp.dot(x, w1t_ref[...], preferred_element_type=jnp.float32)
    h = h + b1_ref[...]
    # Mixed-precision convention: round h to the weight dtype before layer 2
    # (no-op for f32 weights; standard step for a bf16 linear chain).
    y = jnp.dot(h.astype(w2t_ref.dtype), w2t_ref[...],
                preferred_element_type=jnp.float32)
    y = y + b2_ref[...]
    o_ref[...] = y.astype(o_ref.dtype)


# ---------------------------------------------------------------------------
# Fallback kernel (very large d_model): standard (M,N,K)-tiled linear with an
# f32 accumulator; applied twice by the wrapper.
# ---------------------------------------------------------------------------
def _linear_tiled_kernel(x_ref, wt_ref, b_ref, o_ref, acc_ref):
    @pl.when(pl.program_id(2) == 0)
    def _():
        acc_ref[...] = jnp.zeros_like(acc_ref)

    acc_ref[...] += jnp.dot(x_ref[...], wt_ref[...],
                            preferred_element_type=jnp.float32)

    @pl.when(pl.program_id(2) == pl.num_programs(2) - 1)
    def _():
        o_ref[...] = (acc_ref[...] + b_ref[...]).astype(o_ref.dtype)


def _tiled_linear(x2d, wt, b_row, out_dtype, *, tm, tn, tk, vmem_limit):
    """y = x2d @ wt + b_row.  Requires tn | N and tk | K (multiples of 128
    here); the M axis may be ragged (Pallas masks the last row block)."""
    M, K = x2d.shape
    _, N = wt.shape
    grid = (pl.cdiv(M, tm), N // tn, K // tk)
    return pl.pallas_call(
        _linear_tiled_kernel,
        out_shape=jax.ShapeDtypeStruct((M, N), out_dtype),
        grid_spec=pltpu.PrefetchScalarGridSpec(
            num_scalar_prefetch=0,
            grid=grid,
            in_specs=[
                pl.BlockSpec((tm, tk), lambda i, j, k: (i, k)),
                pl.BlockSpec((tk, tn), lambda i, j, k: (k, j)),
                pl.BlockSpec((1, tn), lambda i, j, k: (0, j)),
            ],
            out_specs=pl.BlockSpec((tm, tn), lambda i, j, k: (i, j)),
            scratch_shapes=[pltpu.VMEM((tm, tn), jnp.float32)],
        ),
        compiler_params=pltpu.CompilerParams(
            dimension_semantics=("parallel", "parallel", "arbitrary"),
            vmem_limit_bytes=vmem_limit),
    )(x2d, wt, b_row)


# ---------------------------------------------------------------------------
# Helpers
# ---------------------------------------------------------------------------
def _tpu_vmem_capacity():
    """Per-core VMEM capacity in bytes; conservative 64 MiB if query fails."""
    try:
        return int(pltpu.get_tpu_info().vmem_capacity_bytes)
    except Exception:        # hardware query is best-effort
        return 64 * 1024 * 1024


def _resident_spec(shape):
    """BlockSpec for grid-invariant blocks (weights/biases): single-buffered."""
    idx = lambda i: (0,) * len(shape)
    try:
        return pl.BlockSpec(shape, idx, pipeline_mode=pl.Buffered(1))
    except (TypeError, ValueError):   # jax versions without pipeline_mode
        return pl.BlockSpec(shape, idx)


def _pick_row_tile(M, d_pad, itemsize, tm_req, budget, row_align, num_cores):
    """Largest row tile (aligned to the dtype's sublane packing) that keeps
    resident weights + double-buffered IO + f32 temps within `budget`."""
    tm = min(_round_up(tm_req, row_align), _round_up(M, row_align))
    tm = max(tm, row_align)
    weights = 2 * d_pad * d_pad * itemsize + 4 * d_pad * itemsize
    while tm > row_align:
        io = 2 * 2 * tm * d_pad * itemsize       # double-buffered x + out tiles
        f32_tmp = 2 * tm * d_pad * 4             # h / y f32 intermediates
        if weights + io + f32_tmp <= budget:
            break
        tm = max(row_align, _round_up(tm // 2, row_align))
    if num_cores > 1 and M > row_align:
        # Give every TensorCore at least one row tile (megacore sharding).
        tm = min(tm, max(row_align, _round_up(pl.cdiv(M, num_cores), row_align)))
    return tm


# ---------------------------------------------------------------------------
# Public wrapper
# ---------------------------------------------------------------------------
def multihead_mlp_forward(src, in_proj_weight, in_proj_bias,
                          out_proj_weight, out_proj_bias, *, tm=512):
    """src: (bsize, plen, d_model) -> (bsize, plen, d_model)."""
    bsize, plen, d_model = src.shape
    assert in_proj_weight.shape == (d_model, d_model)
    assert out_proj_weight.shape == (d_model, d_model)

    dtype = src.dtype
    itemsize = jnp.dtype(dtype).itemsize
    if in_proj_bias is None:
        in_proj_bias = jnp.zeros((d_model,), dtype)
    if out_proj_bias is None:
        out_proj_bias = jnp.zeros((d_model,), dtype)

    # ---- generation-aware VMEM budgets ----
    vmem_cap = _tpu_vmem_capacity()               # per-core: 128 MiB v5e/v6e, 64 MiB v7x
    num_cores = 2 if vmem_cap <= (80 << 20) else 1
    budget = int(vmem_cap * 0.80)
    vmem_ceiling = int(vmem_cap * 0.92)           # always below physical VMEM

    # Rows per sublane for packed dtypes (f32 -> 8, bf16 -> 16, int8/fp8 -> 32).
    pack = max(1, 4 // itemsize)
    row_align = 8 * pack

    # Lane padding only (output stores stay lane-dense); M is never padded.
    # TODO(synk): on v6e/v7x an extra pad of d to a multiple of 256 (2x256^2
    # MXU) gains a few % for odd multiples of 128, but costs a full pad pass
    # over the activations; skipped for memory-bound shapes.
    M = bsize * plen
    d_pad = _round_up(d_model, 128)

    x2d = src.reshape(M, d_model)
    if d_pad != d_model:
        x2d = jnp.pad(x2d, ((0, 0), (0, d_pad - d_model)))
        pad_w = ((0, d_pad - d_model), (0, d_pad - d_model))
        w1t = jnp.pad(in_proj_weight.T, pad_w)      # one-time transpose+pad
        w2t = jnp.pad(out_proj_weight.T, pad_w)
    else:
        w1t = in_proj_weight.T                      # one-time 2*d^2 transpose
        w2t = out_proj_weight.T
    b1 = jnp.pad(in_proj_bias, (0, d_pad - d_model)).reshape(1, d_pad)
    b2 = jnp.pad(out_proj_bias, (0, d_pad - d_model)).reshape(1, d_pad)

    resident_bytes = 2 * d_pad * d_pad * itemsize

    if resident_bytes <= int(0.70 * vmem_cap):
        # ---------------- fused, resident-weight path ----------------
        tm_eff = _pick_row_tile(M, d_pad, itemsize, tm, budget, row_align,
                                num_cores)
        grid = (pl.cdiv(M, tm_eff),)

        vmem_needed = (resident_bytes + 4 * d_pad * itemsize
                       + 2 * 2 * tm_eff * d_pad * itemsize
                       + 2 * tm_eff * d_pad * 4
                       + (2 << 20))
        vmem_limit = int(min(max(vmem_needed, 16 << 20), vmem_ceiling))

        cost = pl.CostEstimate(
            flops=4 * M * d_pad * d_pad,             # two matmuls
            transcendentals=0,
            bytes_accessed=(2 * M * d_pad + 2 * d_pad * d_pad + 2 * d_pad)
                           * itemsize)

        # TODO(synk): optional opt-in bf16 compute path for f32 callers on
        # v5e/v6e (native f32 MXU is emulated, ~3x slower) -- numerics change.
        out2d = pl.pallas_call(
            _mlp_fused_kernel,
            out_shape=jax.ShapeDtypeStruct((M, d_pad), dtype),
            grid_spec=pltpu.PrefetchScalarGridSpec(
                num_scalar_prefetch=0,
                grid=grid,
                in_specs=[
                    pl.BlockSpec((tm_eff, d_pad), lambda i: (i, 0)),  # x tile
                    _resident_spec((d_pad, d_pad)),                   # W1^T
                    _resident_spec((1, d_pad)),                       # b1
                    _resident_spec((d_pad, d_pad)),                   # W2^T
                    _resident_spec((1, d_pad)),                       # b2
                ],
                out_specs=pl.BlockSpec((tm_eff, d_pad), lambda i: (i, 0)),
            ),
            compiler_params=pltpu.CompilerParams(
                dimension_semantics=("parallel",),
                vmem_limit_bytes=vmem_limit),
            cost_estimate=cost,
        )(x2d, w1t, b1, w2t, b2)
    else:
        # ------------- two-pass K/N-tiled fallback (huge d_model) -------------
        tile_kn = 512 if d_pad % 512 == 0 else (256 if d_pad % 256 == 0 else 128)
        tm_f = max(row_align,
                   min(_round_up(256, row_align), _round_up(M, row_align)))
        vmem_limit = int(min(48 << 20, vmem_ceiling))
        h2d = _tiled_linear(x2d, w1t, b1, dtype,
                            tm=tm_f, tn=tile_kn, tk=tile_kn,
                            vmem_limit=vmem_limit)
        out2d = _tiled_linear(h2d, w2t, b2, dtype,
                              tm=tm_f, tn=tile_kn, tk=tile_kn,
                              vmem_limit=vmem_limit)

    if d_pad != d_model:
        out2d = out2d[:, :d_model]
    return out2d.reshape(bsize, plen, d_model)


def init_params(key, d_model, nhead, bias=True, dtype=jnp.float32):
    """Deterministic parameter init matching the module's shapes.

    in_proj_weight : xavier_uniform, (d_model, d_model)
    in_proj_bias   : zeros, (d_model,)
    out_proj.weight: kaiming-uniform-style, (d_model, d_model)
    out_proj.bias  : uniform(-1/sqrt(fan_in), +), (d_model,)
    """
    assert d_model % nhead == 0, "embed_dim not divisible by num_heads"
    k1, k2, k3 = jax.random.split(key, 3)

    xav = math.sqrt(6.0 / (d_model + d_model))
    in_proj_weight = jax.random.uniform(k1, (d_model, d_model), dtype,
                                        minval=-xav, maxval=xav)
    in_proj_bias = jnp.zeros((d_model,), dtype) if bias else None

    kai = 1.0 / math.sqrt(d_model)
    out_proj_weight = jax.random.uniform(k2, (d_model, d_model), dtype,
                                         minval=-kai, maxval=kai)
    out_proj_bias = (jax.random.uniform(k3, (d_model,), dtype,
                                        minval=-kai, maxval=kai)
                     if bias else None)
    return in_proj_weight, in_proj_bias, out_proj_weight, out_proj_bias


if __name__ == "__main__":
    key = jax.random.PRNGKey(0)
    k_x, k_p = jax.random.split(key)

    bsize, plen, d_model, nhead = 2, 8, 32, 4
    src = jax.random.normal(k_x, (bsize, plen, d_model), jnp.float32)

    w1, b1, w2, b2 = init_params(k_p, d_model, nhead, bias=True)

    out = multihead_mlp_forward(src, w1, b1, w2, b2)
    out = jax.block_until_ready(out)

    # Pure-JAX reference check (same math as the torch._C._nn.linear chain).
    ref = (src @ w1.T + b1) @ w2.T + b2
    assert out.shape == (bsize, plen, d_model)
    assert jnp.allclose(out, ref, atol=1e-5, rtol=1e-5), "mismatch vs reference"

    print("KERNEL_OK")
</pallas_src>

<mosaic_0001>
module attributes {stable_mosaic.version = 11 : i64} {
  func.func @_mlp_fused_kernel(%arg0: i32, %arg1: memref<8x128xf32, #tpu.memory_space<vmem>>, %arg2: memref<128x128xf32, #tpu.memory_space<vmem>>, %arg3: memref<1x128xf32, #tpu.memory_space<vmem>>, %arg4: memref<128x128xf32, #tpu.memory_space<vmem>>, %arg5: memref<1x128xf32, #tpu.memory_space<vmem>>, %arg6: memref<8x128xf32, #tpu.memory_space<vmem>>) attributes {dimension_semantics = [#tpu.dimension_semantics<parallel>], iteration_bounds = array<i64: 2>, scalar_prefetch = 0 : i64, scratch_operands = 0 : i64, tpu.core_type = #tpu.core_type<tc>, window_params = [{transform_indices = @transform_0, window_bounds = array<i64: 8, 128>}, {pipeline_mode = #tpu.pipeline_mode<synchronous>, transform_indices = @transform_1, window_bounds = array<i64: 128, 128>}, {pipeline_mode = #tpu.pipeline_mode<synchronous>, transform_indices = @transform_2, window_bounds = array<i64: 1, 128>}, {pipeline_mode = #tpu.pipeline_mode<synchronous>, transform_indices = @transform_3, window_bounds = array<i64: 128, 128>}, {pipeline_mode = #tpu.pipeline_mode<synchronous>, transform_indices = @transform_4, window_bounds = array<i64: 1, 128>}, {transform_indices = @transform_5, window_bounds = array<i64: 8, 128>}]} {
    %c0 = arith.constant 0 : index
    %c0_0 = arith.constant 0 : index
    %0 = vector.load %arg1[%c0, %c0_0] : memref<8x128xf32, #tpu.memory_space<vmem>>, vector<8x128xf32>
    %c0_1 = arith.constant 0 : index
    %c0_2 = arith.constant 0 : index
    %1 = vector.load %arg2[%c0_1, %c0_2] : memref<128x128xf32, #tpu.memory_space<vmem>>, vector<128x128xf32>
    %cst = arith.constant dense<0.000000e+00> : vector<8x128xf32>
    %2 = tpu.matmul %0, %1, %cst {dimension_numbers = #tpu.dot_dimension_numbers<[1], [0], [0], [1], [0, 0, 1, 1], [], []>} : vector<8x128xf32>, vector<128x128xf32>, vector<8x128xf32> -> vector<8x128xf32>
    %c0_3 = arith.constant 0 : index
    %c0_4 = arith.constant 0 : index
    %3 = vector.load %arg3[%c0_3, %c0_4] : memref<1x128xf32, #tpu.memory_space<vmem>>, vector<1x128xf32>
    %4 = vector.broadcast %3 : vector<1x128xf32> to vector<8x128xf32>
    %5 = arith.addf %2, %4 : vector<8x128xf32>
    %c0_5 = arith.constant 0 : index
    %c0_6 = arith.constant 0 : index
    %6 = vector.load %arg4[%c0_5, %c0_6] : memref<128x128xf32, #tpu.memory_space<vmem>>, vector<128x128xf32>
    %cst_7 = arith.constant dense<0.000000e+00> : vector<8x128xf32>
    %7 = tpu.matmul %5, %6, %cst_7 {dimension_numbers = #tpu.dot_dimension_numbers<[1], [0], [0], [1], [0, 0, 1, 1], [], []>} : vector<8x128xf32>, vector<128x128xf32>, vector<8x128xf32> -> vector<8x128xf32>
    %c0_8 = arith.constant 0 : index
    %c0_9 = arith.constant 0 : index
    %8 = vector.load %arg5[%c0_8, %c0_9] : memref<1x128xf32, #tpu.memory_space<vmem>>, vector<1x128xf32>
    %9 = vector.broadcast %8 : vector<1x128xf32> to vector<8x128xf32>
    %10 = arith.addf %7, %9 : vector<8x128xf32>
    %c0_10 = arith.constant 0 : index
    %c0_11 = arith.constant 0 : index
    %11 = vector.load %arg6[%c0_10, %c0_11] : memref<8x128xf32, #tpu.memory_space<vmem>>, vector<8x128xf32>
    tpu.vector_store %arg6[%c0_10, %c0_11], %10 {strides = array<i32>} : memref<8x128xf32, #tpu.memory_space<vmem>>, vector<8x128xf32>,
    return
  }
  func.func @transform_0(%arg0: i32) -> (i32, i32) {
    %c0_i32 = arith.constant 0 : i32
    %c0_i32_0 = arith.constant 0 : i32
    return %arg0, %c0_i32 : i32, i32
  }
  func.func @transform_1(%arg0: i32) -> (i32, i32) {
    %c0_i32 = arith.constant 0 : i32
    %c0_i32_0 = arith.constant 0 : i32
    %c0_i32_1 = arith.constant 0 : i32
    return %c0_i32, %c0_i32_0 : i32, i32
  }
  func.func @transform_2(%arg0: i32) -> (i32, i32) {
    %c0_i32 = arith.constant 0 : i32
    %c0_i32_0 = arith.constant 0 : i32
    %c0_i32_1 = arith.constant 0 : i32
    return %c0_i32, %c0_i32_0 : i32, i32
  }
  func.func @transform_3(%arg0: i32) -> (i32, i32) {
    %c0_i32 = arith.constant 0 : i32
    %c0_i32_0 = arith.constant 0 : i32
    %c0_i32_1 = arith.constant 0 : i32
    return %c0_i32, %c0_i32_0 : i32, i32
  }
  func.func @transform_4(%arg0: i32) -> (i32, i32) {
    %c0_i32 = arith.constant 0 : i32
    %c0_i32_0 = arith.constant 0 : i32
    %c0_i32_1 = arith.constant 0 : i32
    return %c0_i32, %c0_i32_0 : i32, i32
  }
  func.func @transform_5(%arg0: i32) -> (i32, i32) {
    %c0_i32 = arith.constant 0 : i32
    %c0_i32_0 = arith.constant 0 : i32
    return %arg0, %c0_i32 : i32, i32
  }
}

</mosaic_0001>

<bundles_post_ra>
// kernel: tpu_custom_call.1
= control target key start
LH: loop header
LB: loop body
LE: loop exit
PB: predicated region body
PF: predicated region fallthrough
CT: control target
= control target key end

     0   :  { %10 = vsyncpa [#allocation3], 0  ;;  %s1257_s0 = inlined_call_operand.hbm [shape: f32[16,128], index: 0, kind: input, shape index: {}]   ;;  %s1258_s1 = inlined_call_operand.hbm [shape: f32[128,128], index: 1, kind: input, shape index: {}]   ;;  %s1259_s2 = inlined_call_operand.vmem [shape: f32[1,128], index: 2, kind: input, shape index: {}]   ;;  %s1260_s3 = inlined_call_operand.hbm [shape: f32[128,128], index: 3, kind: input, shape index: {}]   ;;  %s1261_s4 = inlined_call_operand.vmem [shape: f32[1,128], index: 4, kind: input, shape index: {}]   ;;  %s1262_s5 = inlined_call_operand.hbm [shape: f32[16,128], index: 5, kind: output, shape index: {}]  }
   0x1   :  { %12 = vsyncpa [#allocation3 + $0x1], 0 }
   0x2   :  { %13 = vsyncpa [#allocation6], 0 }
   0x3   :  { %14 = vsyncpa [#allocation4], 0 }
   0x4   :  { %16 = vsyncpa [#allocation4 + $0x1], 0  ;;  %s999_s18 = smov 0   ;;  %s1001_s19 = smov 0  }
   0x5   :  { %s1003_s20 = smov 0   ;;  %s1005_s21 = smov 0  }
   0x6 LB: > { %s1020_s22 = sadd.s32 4294967295, %s958_s21   ;;  %s560_s23 = sadd.s32 4294967294, %s958_s21   ;;  %s958_s21 = sphi %s1005_s21, %s1282_s21   ;;  %s954_s20 = sphi %s1003_s20, %s1281_s20   ;;  %s950_s19 = sphi %s1001_s19, %s1280_s19   ;;  %s946_s18 = sphi %s999_s18, %s1279_s18  }
   0x7   : > { %p42_p0 = scmp.ne.s32.totalorder %s950_s19, %s946_s18  ;;  %p1263_p1 = scmp.eq.s32.totalorder %s1020_s22, 0 }
   0x8   : > { %p156_p3 = scmp.eq.s32.totalorder %s560_s23, 1  ;;  %p561_p5 = scmp.ge.s32.totalorder %s958_s21, 1 }
   0x9   : > { %p1029_p4 = por %p1263_p1, %p42_p0  ;;  %p163_p7 = scmp.lt.s32.totalorder %s958_s21, 3 }
   0xa   : > { %p1034_p6 = por %p156_p3, %p42_p0  ;;  %s960_s27 = smov [#allocation5]  }
   0xb   : > { %s1266_s24 = scalar_select %p1029_p4, 1, 0 }
   0xc   : > { %s1267_s25 = scalar_select %p1034_p6, 1, 0 }
   0xd   : > { %p1039_p8 = pnand %p561_p5, %p163_p7  ;;  %s175_s28 = sshll.u32 %s960_s27, 4  ;;  %s1043_s28 = int_to_ptr.vmem [resolvable:$true] %s175_s28 }
   0xe   : > { %s961_s30 = smov [#allocation7]   ;;  %s802_s9 = scalar_lea.hbm %s1258_s1, 2048 }
   0xf   : > { %p742_p9 = pneg %p1039_p8  ;;  %s191_s6 = sshll.u32 %s961_s30, 4  ;;  %s1054_s6 = int_to_ptr.vmem [resolvable:$true] %s191_s6 }
  0x10   : > { %p803_p12 = scmp.ne.s32.totalorder %s1258_s1, %s802_s9  ;;  %p809_p5 = scmp.lt.u32.totalorder %s802_s9, %s1258_s1 }
  0x11   : > { %p1050_p11 = pnand %p742_p9, %p1263_p1 }
  0x13   : > { %p804_p13 = pneg %p1050_p11 }
  0x15   : > { %p805_p0 = pnand %p804_p13, %p803_p12 }
  0x17   : > { %p806_p3 = pneg %p805_p0 }
  0x19   : > { %p811_p7 = pnand %p809_p5, %p806_p3 }
  0x1b   : > { %814 = shalt.err (!%p811_p7)
}
  0x1c   : > { %s815_s14 = scalar_lea.vmem %s1043_s28, 2048  ;;  %p823_p2 = scmp.lt.s32.totalorder %s1043_s28, %s1043_s28 }
  0x1d   : > { %p816_p9 = scmp.ne.s32.totalorder %s1043_s28, %s815_s14  ;;  %p824_p12 = scmp.lt.s32.totalorder %s815_s14, %s815_s14 }
  0x1f   : > { %p818_p10 = pnand %p816_p9, %p804_p13  ;;  %p825_p0 = por %p824_p12, %p823_p2 }
  0x21   : > { %p819_p1 = pneg %p818_p10 }
  0x23   : > { %p826_p6 = pnand %p825_p0, %p819_p1 }
  0x25   : > { %829 = shalt.err (!%p826_p6)
}
  0x26   : > { %s962_s15 = smov 128   ;;  %s963_s16 = smov 8  }
  0x27   : > { %745 = dma.hbm_to_vmem [thread:$0]  (!%p1050_p11), %s1258_s1, 2048, %s1043_s28, [#allocation6], %s962_s15, %s962_s15, %s963_s16  }
  0x28   : > { %s830_s7 = scalar_lea.hbm %s1260_s3, 2048 }
  0x29   : > { %p831_p2 = scmp.ne.s32.totalorder %s1260_s3, %s830_s7  ;;  %p837_p10 = scmp.lt.u32.totalorder %s830_s7, %s1260_s3 }
  0x2b   : > { %p833_p1 = pnand %p831_p2, %p804_p13 }
  0x2d   : > { %p834_p6 = pneg %p833_p1 }
  0x2f   : > { %p839_p3 = pnand %p837_p10, %p834_p6 }
  0x31   : > { %842 = shalt.err (!%p839_p3)
}
  0x32   : > { %s843_s28 = scalar_lea.vmem %s1054_s6, 2048  ;;  %p851_p12 = scmp.lt.s32.totalorder %s1054_s6, %s1054_s6 }
  0x33   : > { %p844_p5 = scmp.ne.s32.totalorder %s1054_s6, %s843_s28  ;;  %p852_p0 = scmp.lt.s32.totalorder %s843_s28, %s843_s28 }
  0x35   : > { %p846_p7 = pnand %p844_p5, %p804_p13  ;;  %p853_p2 = por %p852_p0, %p851_p12 }
  0x37   : > { %p847_p9 = pneg %p846_p7 }
  0x39   : > { %p854_p1 = pnand %p853_p2, %p847_p9 }
  0x3b   : > { %857 = shalt.err (!%p854_p1)
}
  0x3c   : > { %748 = dma.hbm_to_vmem [thread:$0]  (!%p1050_p11), %s1260_s3, 2048, %s1054_s6, [#allocation6], %s962_s15, %s962_s15, %s963_s16  }
  0x3d   : > { %s1109_s14 = sadd.s32 1, %s958_s21   ;;  %s29_s29 = sadd.s32 1, %s954_s20 }
  0x3e   : > { %s26_s17 = ssub.s32 %s958_s21, %s1109_s14  ;;  %p36_p13 = scmp.ne.s32.totalorder %s954_s20, %s950_s19 }
  0x3f   : > { %p27_p6 = scmp.eq.s32.totalorder %s26_s17, 0  ;;  %p37_p10 = scmp.eq.s32.totalorder %s958_s21, 0 }
  0x40   : > { %p1270_p3 = scmp.eq.s32.totalorder %s1020_s22, 1  ;;  %p759_p7 = scmp.lt.s32.totalorder %s958_s21, 2 }
  0x41   : > { %s1125_s27 = scalar_select %p27_p6, %s954_s20, %s29_s29  }
  0x42   : > { %p1119_p5 = por %p1270_p3, %p36_p13  ;;  %p38_p9 = por %p37_p10, %p36_p13 }
  0x43   : > { %s208_s30 = sand.u32 1, %s954_s20   ;;  %s566_s6 = sshll.u32 %s958_s21, 7 }
  0x44   : > { %s1271_s23 = scalar_select %p1119_p5, 1, 0 }
  0x45   : > { %s565_s7 = sshll.u32 %s208_s30, 3  ;;  %s1132_s8 = scalar_lea.hbm %s1257_s0, %s566_s6 }
  0x46   : > { %s212_s9 = scalar_lea.vmem [#allocation2], %s565_s7  ;;  %p1136_p11 = pnand %p759_p7, %p38_p9 }
  0x47   : > { %s219_s10 = sshll.u32 %s212_s9, 4  ;;  %s209_s28 = scalar_lea.sflag [#allocation3], %s208_s30  ;;  %s1134_s10 = int_to_ptr.vmem [resolvable:$true] %s219_s10 }
  0x48   : > { %s858_s12 = scalar_lea.hbm %s1132_s8, 128  ;;  %p860_p0 = pneg %p1136_p11 }
  0x49   : > { %p859_p12 = scmp.ne.s32.totalorder %s1132_s8, %s858_s12  ;;  %s863_s17 = scalar_lea.hbm %s1257_s0, 256 }
  0x4a   : > { %p864_p13 = scmp.lt.u32.totalorder %s1132_s8, %s1257_s0  ;;  %p865_p6 = scmp.lt.u32.totalorder %s863_s17, %s858_s12 }
  0x4b   : > { %p861_p2 = pnand %p860_p0, %p859_p12  ;;  %p867_p3 = scmp.lt.u32.totalorder %s858_s12, %s1132_s8 }
  0x4c   : > { %p866_p10 = por %p865_p6, %p864_p13 }
  0x4d   : > { %p862_p1 = pneg %p861_p2 }
  0x4e   : > { %p868_p7 = por %p867_p3, %p866_p10 }
  0x50   : > { %p869_p9 = pnand %p868_p7, %p862_p1 }
  0x52   : > { %872 = shalt.err (!%p869_p9)
}
  0x53   : > { %s873_s30 = scalar_lea.vmem %s1134_s10, 128  ;;  %s964_s15 = smov [#allocation2]  }
  0x54   : > { %p874_p12 = scmp.ne.s32.totalorder %s1134_s10, %s873_s30  ;;  %s878_s16 = sshll.u32 %s964_s15, 4  ;;  %s879_s16 = int_to_ptr.vmem [resolvable:$false] %s878_s16 }
  0x55   : > { %s880_s9 = scalar_lea.vmem %s879_s16, 256  ;;  %p881_p4 = scmp.lt.s32.totalorder %s1134_s10, %s879_s16 }
  0x56   : > { %p876_p2 = pnand %p874_p12, %p860_p0  ;;  %p882_p13 = scmp.lt.s32.totalorder %s880_s9, %s873_s30 }
  0x58   : > { %p877_p5 = pneg %p876_p2  ;;  %p883_p6 = por %p882_p13, %p881_p4 }
  0x5a   : > { %p884_p10 = pnand %p883_p6, %p877_p5 }
  0x5c   : > { %887 = shalt.err (!%p884_p10)
}
  0x5d   : > { %752 = dma.hbm_to_vmem [thread:$0]  (!%p1136_p11), %s1132_s8, 128, %s1134_s10, %s209_s28  }
  0x5e   : > { %228 = sbr.rel (%p1039_p8) target bundleno = 581 (0x245), region = 40  ;;  %s1168_s12 = sand.u32 (!%p1039_p8), 1, %s950_s19  }
  0x5f   : > { %s568_s13 = sshll.u32 (!%p1039_p8), %s1168_s12, 3  ;;  %s231_s29 = scalar_lea.sflag (!%p1039_p8), [#allocation3], %s1168_s12 }
  0x60   : > { %s1174_s17 = scalar_lea.vmem (!%p1039_p8), [#allocation2], %s568_s13  ;;  %p1273_p4 = scmp.ne.s32.totalorder (!%p1039_p8), %s1266_s24, 0 }
  0x65   : > { %933 = dma.done.wait (%p1273_p4), %s231_s29, 128  }
  0x66   : > { %935 = vsyncadd (%p1273_p4), %s231_s29, 4294967168  ;;  %p1274_p5 = scmp.eq.s32.totalorder %s1020_s22, 0 }
  0x68   : > { %937 = dma.done.wait (%p1274_p5), [#allocation6], 4096   ;;  %p1275_p8 = pmov %p1274_p5 }
  0x69   : > { %v965_v0 = vmov 0.0|0.0   ;;  %vm966_vm0 = vmmov 0   ;;  %v967_v1 = vmov 0.0   ;;  %v270_v2 = vld [vmem:[#allocation5] sm:$0xff]  ;;  %v271_v3 = vld [vmem:[#allocation5 + $0x8] sm:$0xff]  ;;  %v272_v4 = vld [vmem:[#allocation5 + $0x10] sm:$0xff] }
  0x6a   : > { %939 = vsyncadd (%p1275_p8), [#allocation6], 4294963200  ;;  %682 = vmatprep.subr.bf16.mxu0 %v965_v0  ;;  %644 = vmatprep.mubr.msk.f32.mxu0 %vm966_vm0, %v967_v1  ;;  %v683_v5 = vpack.c.bf16 %v271_v3, %v270_v2  ;;  %v273_v6 = vld [vmem:[#allocation5 + $0x18] sm:$0xff]  ;;  %v274_v8 = vld [vmem:[#allocation5 + $0x20] sm:$0xff]  ;;  %s575_s11 = sshll.u32 %s1020_s22, 7  ;;  %s268_s28 = scalar_lea.vmem [#allocation8], %s568_s13 }
  0x6b   : > { %706 = vmatprep.subr.bf16.mxu1 %v965_v0  ;;  %679 = vmatprep.mubr.msk.f32.mxu1 %vm966_vm0, %v967_v1  ;;  %v686_v7 = vpack.c.bf16 %v273_v6, %v272_v4  ;;  %v275_v9 = vld [vmem:[#allocation5 + $0x28] sm:$0xff]  ;;  %v363_v10 = vld [vmem:[#allocation7] sm:$0xff]  ;;  %v365_v12 = vld [vmem:[#allocation7 + $0x10] sm:$0xff]  ;;  %s471_s7 = sshll.u32 %s268_s28, 4  ;;  %s1213_s15 = scalar_lea.hbm %s1262_s5, %s575_s11  ;;  %s1215_s7 = int_to_ptr.vmem [resolvable:$true] %s471_s7 }
  0x6c   : > { %684 = vmatpush3.bf16.msra.mxu0 %v683_v5  ;;  %v364_v11 = vld [vmem:[#allocation7 + $0x8] sm:$0xff]  ;;  %v366_v13 = vld [vmem:[#allocation7 + $0x18] sm:$0xff]  ;;  %v689_v14 = vpack.c.bf16 %v275_v9, %v274_v8  ;;  %v276_v16 = vld [vmem:[#allocation5 + $0x30] sm:$0xff]  ;;  %s458_s16 = scalar_lea.sflag [#allocation4], %s1168_s12  ;;  %s888_s9 = scalar_lea.vmem %s1215_s7, 128 }
  0x6d   : > { %685 = vmatprep.subr.bf16.mxu0 %v965_v0  ;;  %v707_v15 = vpack.c.bf16 %v364_v11, %v363_v10  ;;  %v277_v17 = vld [vmem:[#allocation5 + $0x38] sm:$0xff]  ;;  %v710_v18 = vpack.c.bf16 %v366_v13, %v365_v12  ;;  %v367_v19 = vld [vmem:[#allocation7 + $0x20] sm:$0xff]  ;;  %v368_v20 = vld [vmem:[#allocation7 + $0x28] sm:$0xff]  ;;  %p889_p11 = scmp.ne.s32.totalorder %s1215_s7, %s888_s9  ;;  %p1276_p0 = scmp.ne.s32.totalorder %s1271_s23, 0 }
  0x6e   : > { %v692_v21 = vpack.c.bf16 %v277_v17, %v276_v16  ;;  %v278_v22 = vld [vmem:[#allocation5 + $0x40] sm:$0xff]  ;;  %v279_v23 = vld [vmem:[#allocation5 + $0x48] sm:$0xff]  ;;  %v713_v24 = vpack.c.bf16 %v368_v20, %v367_v19  ;;  %v369_v25 = vld [vmem:[#allocation7 + $0x30] sm:$0xff]  ;;  %s968_s22 = smov [#allocation8]  }
  0x6f   : > { %708 = vmatpush3.bf16.msra.mxu1 %v707_v15  ;;  %v370_v26 = vld [vmem:[#allocation7 + $0x38] sm:$0xff]  ;;  %v695_v27 = vpack.c.bf16 %v279_v23, %v278_v22  ;;  %v280_v28 = vld [vmem:[#allocation5 + $0x50] sm:$0xff]  ;;  %v371_v31 = vld [vmem:[#allocation7 + $0x40] sm:$0xff]  ;;  %p890_p1 = pnand %p889_p11, %p1276_p0  ;;  %s892_s13 = sshll.u32 %s968_s22, 4  ;;  %s893_s13 = int_to_ptr.vmem [resolvable:$false] %s892_s13 }
  0x70   : > { %687 = vmatpush3.bf16.msra.mxu0 %v686_v7  ;;  %709 = vmatprep.subr.bf16.mxu1 %v965_v0  ;;  %v281_v29 = vld [vmem:[#allocation5 + $0x58] sm:$0xff]  ;;  %v716_v30 = vpack.c.bf16 %v370_v26, %v369_v25  ;;  %v372_v32 = vld [vmem:[#allocation7 + $0x48] sm:$0xff]  ;;  %v282_v34 = vld [vmem:[#allocation5 + $0x60] sm:$0xff]  ;;  %s894_s29 = scalar_lea.vmem %s893_s13, 256  ;;  %p895_p7 = scmp.lt.s32.totalorder %s1215_s7, %s893_s13 }
  0x71   : > { %688 = vmatprep.subr.bf16.mxu0 %v965_v0  ;;  %v698_v33 = vpack.c.bf16 %v281_v29, %v280_v28  ;;  %v283_v35 = vld [vmem:[#allocation5 + $0x68] sm:$0xff]  ;;  %v719_v36 = vpack.c.bf16 %v372_v32, %v371_v31  ;;  %v373_v37 = vld [vmem:[#allocation7 + $0x50] sm:$0xff]  ;;  %v374_v38 = vld [vmem:[#allocation7 + $0x58] sm:$0xff]  ;;  %p891_p3 = pneg %p890_p1  ;;  %p896_p9 = scmp.lt.s32.totalorder %s894_s29, %s888_s9 }
  0x72   : > { %v701_v39 = vpack.c.bf16 %v283_v35, %v282_v34  ;;  %v284_v40 = vld [vmem:[#allocation5 + $0x70] sm:$0xff]  ;;  %v285_v41 = vld [vmem:[#allocation5 + $0x78] sm:$0xff]  ;;  %v722_v42 = vpack.c.bf16 %v374_v38, %v373_v37  ;;  %v375_v43 = vld [vmem:[#allocation7 + $0x60] sm:$0xff] }
  0x73   : > { %711 = vmatpush3.bf16.msra.mxu1 %v710_v18  ;;  %v376_v44 = vld [vmem:[#allocation7 + $0x68] sm:$0xff]  ;;  %v704_v45 = vpack.c.bf16 %v285_v41, %v284_v40  ;;  %v269_v47 = vld [vmem:[%s1174_s17] sm:$0xff]  ;;  %p897_p12 = por %p896_p9, %p895_p7 }
  0x74   : > { %690 = vmatpush3.bf16.msra.mxu0 %v689_v14  ;;  %712 = vmatprep.subr.bf16.mxu1 %v965_v0  ;;  %v725_v46 = vpack.c.bf16 %v376_v44, %v375_v43  ;;  %v377_v48 = vld [vmem:[#allocation7 + $0x70] sm:$0xff]  ;;  %v378_v49 = vld [vmem:[#allocation7 + $0x78] sm:$0xff] }
  0x75   : > { %691 = vmatprep.subr.bf16.mxu0 %v965_v0  ;;  %v728_v50 = vpack.c.bf16 %v378_v49, %v377_v48  ;;  %v572_v51 = vld [vmem:[%s1259_s2] ss:$0 sm:$0xff]  ;;  %p898_p2 = pnand %p897_p12, %p891_p3 }
  0x76   : > { %v573_v55 = vld [vmem:[%s1261_s4] ss:$0 sm:$0xff] }
  0x77   : > { %714 = vmatpush3.bf16.msra.mxu1 %v713_v24 }
  0x78   : > { %693 = vmatpush3.bf16.msra.mxu0 %v692_v21  ;;  %715 = vmatprep.subr.bf16.mxu1 %v965_v0 }
  0x79   : > { %694 = vmatprep.subr.bf16.mxu0 %v965_v0 }
  0x7b   : > { %717 = vmatpush3.bf16.msra.mxu1 %v716_v30 }
  0x7c   : > { %696 = vmatpush3.bf16.msra.mxu0 %v695_v27  ;;  %718 = vmatprep.subr.bf16.mxu1 %v965_v0 }
  0x7d   : > { %697 = vmatprep.subr.bf16.mxu0 %v965_v0 }
  0x7f   : > { %720 = vmatpush3.bf16.msra.mxu1 %v719_v36 }
  0x80   : > { %699 = vmatpush3.bf16.msra.mxu0 %v698_v33  ;;  %721 = vmatprep.subr.bf16.mxu1 %v965_v0 }
  0x81   : > { %700 = vmatprep.subr.bf16.mxu0 %v965_v0 }
  0x83   : > { %723 = vmatpush3.bf16.msra.mxu1 %v722_v42 }
  0x84   : > { %702 = vmatpush3.bf16.msra.mxu0 %v701_v39  ;;  %724 = vmatprep.subr.bf16.mxu1 %v965_v0 }
  0x85   : > { %703 = vmatprep.subr.bf16.mxu0 %v965_v0 }
  0x87   : > { %726 = vmatpush3.bf16.msra.mxu1 %v725_v46 }
  0x88   : > { %705 = vmatpush3.bf16.msra.mxu0 %v704_v45  ;;  %727 = vmatprep.subr.bf16.mxu1 %v965_v0 }
  0x8b   : > { %645 = vmatmul.mubr.f32.vlgmr.msra.gmra.mrb[0].mxu0 %v269_v47  ;;  %729 = vmatpush3.bf16.msra.mxu1 %v728_v50 }
 0x15e   : > { %v359_v52 = vpop.f32.mrb[0].mxu0 }
 0x15f   : > { %v360_v53 = vadd.f32 %v572_v51, %v359_v52  ;;  %v646_v54 = vpop.f32.mrb[1].mxu0 }
 0x161   : > { %680 = vmatmul.mubr.f32.vlgmr.msra.gmra.mrb[0].mxu1 %v360_v53 }
 0x234   : > { %v452_v56 = vpop.f32.mrb[0].mxu1 }
 0x235   : > { %v453_v57 = vadd.f32 %v573_v55, %v452_v56  ;;  %v681_v58 = vpop.f32.mrb[1].mxu1 }
 0x237   : > { %456 = vst [vmem:[%s268_s28] sm:$0xff] %v453_v57 }
 0x238   : > { %901 = shalt.err (!%p898_p2)
}
 0x239   : > { %s902_s12 = scalar_lea.hbm %s1213_s15, 128  ;;  %s906_s26 = scalar_lea.hbm %s1262_s5, 256 }
 0x23a   : > { %p903_p13 = scmp.ne.s32.totalorder %s1213_s15, %s902_s12  ;;  %p907_p4 = scmp.lt.u32.totalorder %s1213_s15, %s1262_s5 }
 0x23b   : > { %p908_p5 = scmp.lt.u32.totalorder %s906_s26, %s902_s12  ;;  %p910_p11 = scmp.lt.u32.totalorder %s902_s12, %s1213_s15 }
 0x23c   : > { %p904_p6 = pnand %p903_p13, %p1276_p0 }
 0x23d   : > { %p909_p8 = por %p908_p5, %p907_p4 }
 0x23e   : > { %p905_p10 = pneg %p904_p6 }
 0x23f   : > { %p911_p1 = por %p910_p11, %p909_p8 }
 0x241   : > { %p912_p3 = pnand %p911_p1, %p905_p10 }
 0x243   : > { %915 = shalt.err (!%p912_p3)
}
 0x244   : > { %740 = dma.vmem_to_hbm [thread:$0]  (%p1276_p0), %s1215_s7, 128, %s1213_s15, %s458_s16  }
 0x245 PF: > { %s483_s11 = sand.u32 1, %s946_s18   ;;  %p1277_p7 = scmp.ne.s32.totalorder %s1267_s25, 0 }
 0x246   : > { %p1278_p9 = scmp.ge.s32.totalorder %s958_s21, 2  ;;  %s484_s28 = scalar_lea.sflag [#allocation4], %s483_s11 }
 0x248   : > { %p754_p12 = pnand %p1278_p9, %p1277_p7 }
 0x24a   : > { %941 = dma.done.wait (!%p754_p12), %s484_s28, 128  }
 0x24b   : > { %943 = vsyncadd (!%p754_p12), %s484_s28, 4294967168  ;;  %p19_p2 = scmp.ge.s32.totalorder %s1109_s14, 4   ;;  %s1279_s18 = smov %s950_s19 }
 0x24c   : > { %s1280_s19 = smov %s954_s20  ;;  %s1281_s20 = smov %s1125_s27 }
 0x24d   : > { %s1282_s21 = smov %s1109_s14  ;;  %21 = sbr.rel (!%p19_p2) target bundleno = 6 (0x6), region = 93 }
 0x254   :  { %489 = vsyncpa [#allocation3], 1 }
 0x255   :  { %491 = vsyncpa [#allocation3 + $0x1], 1 }
 0x256   :  { %492 = vsyncpa [#allocation6], 1 }
 0x257   :  { %493 = vsyncpa [#allocation4], 1 }
 0x258   :  { %495 = vsyncpa [#allocation4 + $0x1], 1 }

</bundles_post_ra>
